<compile_context>
chip_gen: v6e
topology: v6e:2x2x1
jax: 0.10.0
libtpu: 0.0.40
codegen_flags: <defaults>
</compile_context>

<pallas_src>
import functools

import jax
import jax.numpy as jnp
from jax.experimental import pallas as pl
from jax.experimental.pallas import tpu as pltpu


def _round_up(x, m):
    return ((x + m - 1) // m) * m


def _rearrange_patches(x, patch_size):
    # einops: 'b c (h p1) (w p2) -> b (h w) (p1 p2 c)'
    B, C, H, W = x.shape
    p = patch_size
    h, w = H // p, W // p
    x = x.reshape(B, C, h, p, w, p)
    x = x.transpose(0, 2, 4, 3, 5, 1)          # (B, h, w, p1, p2, C)
    return x.reshape(B, h * w, p * p * C)      # (B, N, P)


def _patch_embed_kernel(p_ref, w_ref, add_ref, o_ref):
    # p_ref:   (TM, P_pad)  bf16  — flattened patch rows (row 0 of each image
    #                               is all-zeros -> becomes the cls row)
    # w_ref:   (P_pad, E_pad) bf16 — projection weight, constant across grid
    # add_ref: (TM, E_pad)  f32   — per-row additive table:
    #                               row 0: cls + pos[0]; rows 1..N: bias + pos
    # o_ref:   (TM, E_pad)  f32
    proj = jnp.dot(p_ref[...], w_ref[...], preferred_element_type=jnp.float32)
    # One VPU add + one full, aligned store per tile.
    o_ref[...] = (proj + add_ref[...]).astype(o_ref.dtype)


@functools.partial(jax.jit,
                   static_argnames=("patch_size", "block_m", "compute_dtype"))
def patch_embedding(x, w, b, cls_token, pos_embedding, patch_size,
                    *, block_m=256, compute_dtype=jnp.bfloat16):
    """x: (B, C, H, W) f32 -> (B, num_patches + 1, embed_dim) f32."""
    B, C, H, W = x.shape
    p = patch_size
    N = (H // p) * (W // p)
    P = p * p * C
    E = w.shape[1]
    Np1 = N + 1

    # Lane (last) dims padded to 128; row dim padded to a 16-multiple tile so
    # bf16 (16,128) and f32 (8,128) tiles are both dense and unmasked.
    P_pad = _round_up(P, 128)
    E_pad = _round_up(E, 128)
    if _round_up(Np1, 16) <= block_m:
        TM = _round_up(Np1, 16)          # one tile covers a whole image
        Np1_pad = TM
    else:
        TM = block_m                     # multiple of 128 by default
        Np1_pad = _round_up(Np1, TM)
    tiles_per_image = Np1_pad // TM
    grid = (B * tiles_per_image,)

    # ---- wrapper-side prep (fusible into the pallas_call input DMA) --------
    patches = _rearrange_patches(x, p).astype(compute_dtype)        # (B,N,P)
    # Prepend one zero row per image (cls slot) and zero-pad M / K.
    patches_ext = jnp.pad(patches,
                          ((0, 0), (1, Np1_pad - Np1), (0, P_pad - P)))
    patches_flat = patches_ext.reshape(B * Np1_pad, P_pad)          # (M, Pp)

    w_pad = jnp.pad(w, ((0, P_pad - P), (0, E_pad - E))).astype(compute_dtype)

    pos2 = pos_embedding.reshape(Np1, E).astype(jnp.float32)
    add = jnp.concatenate(
        [cls_token.reshape(1, E).astype(jnp.float32) + pos2[:1],    # row 0
         b.reshape(1, E).astype(jnp.float32) + pos2[1:]], axis=0)   # rows 1..N
    add = jnp.pad(add, ((0, Np1_pad - Np1), (0, E_pad - E)))        # (Np1p,Ep)

    # NOTE: w_pad / add have constant index_maps, so Pallas fetches them once
    # and keeps them resident (on v7x with very large E one could additionally
    # single-buffer them via pipeline_mode=pl.Buffered(1)).
    out = pl.pallas_call(
        _patch_embed_kernel,
        out_shape=jax.ShapeDtypeStruct((B * Np1_pad, E_pad), jnp.float32),
        grid_spec=pltpu.PrefetchScalarGridSpec(
            num_scalar_prefetch=0,
            grid=grid,
            in_specs=[
                pl.BlockSpec((TM, P_pad), lambda t: (t, 0)),
                pl.BlockSpec((P_pad, E_pad), lambda t: (0, 0)),
                pl.BlockSpec((TM, E_pad),
                             lambda t: (t % tiles_per_image, 0)),
            ],
            out_specs=pl.BlockSpec((TM, E_pad), lambda t: (t, 0)),
        ),
        compiler_params=pltpu.CompilerParams(
            dimension_semantics=("parallel",),
            vmem_limit_bytes=32 * 1024 * 1024,
            allow_input_fusion=[True, False, False],
        ),
    )(patches_flat, w_pad, add)

    # Strip the M / E padding (real ViT dims have E % 128 == 0, so only a few
    # padded rows are trimmed here).
    return out.reshape(B, Np1_pad, E_pad)[:, :Np1, :E]


if __name__ == "__main__":
    # Small shapes consistent with the module's forward:
    # image_size=16, patch_size=4, in_channels=4, embed_dim=32
    B, C, H, W = 2, 4, 16, 16
    patch_size = 4
    num_patches = (H // patch_size) * (W // patch_size)     # 16
    patch_dim = patch_size * patch_size * C                 # 64
    embed_dim = 32

    key = jax.random.PRNGKey(0)
    kx, kw, kb, kc, kp = jax.random.split(key, 5)

    x = jax.random.normal(kx, (B, C, H, W), dtype=jnp.float32)
    # nn.Linear(patch_dim, embed_dim): torch weight is (embed_dim, patch_dim);
    # stored here already transposed as (patch_dim, embed_dim).
    w = jax.random.normal(kw, (patch_dim, embed_dim), dtype=jnp.float32) * 0.02
    b = jax.random.normal(kb, (embed_dim,), dtype=jnp.float32) * 0.02
    cls_token = jax.random.normal(kc, (1, 1, embed_dim), dtype=jnp.float32)
    pos_embedding = jax.random.normal(
        kp, (1, num_patches + 1, embed_dim), dtype=jnp.float32)

    out = patch_embedding(x, w, b, cls_token, pos_embedding, patch_size)
    out = jax.block_until_ready(out)

    # Pure-JAX references.
    patches = _rearrange_patches(x, patch_size)
    cls_exp = jnp.broadcast_to(cls_token, (B, 1, embed_dim))

    # (a) same bf16-matmul numerics as the kernel -> tight tolerance
    proj_bf16 = jnp.dot(patches.astype(jnp.bfloat16), w.astype(jnp.bfloat16),
                        preferred_element_type=jnp.float32) + b
    ref_bf16 = jnp.concatenate([cls_exp, proj_bf16], axis=1) + pos_embedding

    # (b) full-f32 reference (PyTorch semantics) -> bf16-level tolerance
    proj_f32 = patches @ w + b
    ref_f32 = jnp.concatenate([cls_exp, proj_f32], axis=1) + pos_embedding

    assert out.shape == (B, num_patches + 1, embed_dim)
    assert jnp.allclose(out, ref_bf16, atol=5e-3, rtol=5e-3)
    assert jnp.allclose(out, ref_f32, atol=5e-2, rtol=5e-2)
    print("KERNEL_OK")
</pallas_src>

<mosaic_0001>
module attributes {stable_mosaic.version = 11 : i64} {
  func.func @_patch_embed_kernel(%arg0: i32, %arg1: memref<32x128xbf16, #tpu.memory_space<vmem>>, %arg2: memref<128x128xbf16, #tpu.memory_space<vmem>>, %arg3: memref<32x128xf32, #tpu.memory_space<vmem>>, %arg4: memref<32x128xf32, #tpu.memory_space<vmem>>) attributes {dimension_semantics = [#tpu.dimension_semantics<parallel>], iteration_bounds = array<i64: 2>, scalar_prefetch = 0 : i64, scratch_operands = 0 : i64, tpu.core_type = #tpu.core_type<tc>, window_params = [{transform_indices = @transform_0, window_bounds = array<i64: 32, 128>}, {pipeline_mode = #tpu.pipeline_mode<synchronous>, transform_indices = @transform_1, window_bounds = array<i64: 128, 128>}, {transform_indices = @transform_2, window_bounds = array<i64: 32, 128>}, {transform_indices = @transform_3, window_bounds = array<i64: 32, 128>}]} {
    %c0 = arith.constant 0 : index
    %c0_0 = arith.constant 0 : index
    %0 = vector.load %arg1[%c0, %c0_0] : memref<32x128xbf16, #tpu.memory_space<vmem>>, vector<32x128xbf16>
    %c0_1 = arith.constant 0 : index
    %c0_2 = arith.constant 0 : index
    %1 = vector.load %arg2[%c0_1, %c0_2] : memref<128x128xbf16, #tpu.memory_space<vmem>>, vector<128x128xbf16>
    %cst = arith.constant dense<0.000000e+00> : vector<32x128xf32>
    %2 = tpu.matmul %0, %1, %cst {dimension_numbers = #tpu.dot_dimension_numbers<[1], [0], [0], [1], [0, 0, 1, 1], [], []>} : vector<32x128xbf16>, vector<128x128xbf16>, vector<32x128xf32> -> vector<32x128xf32>
    %c0_3 = arith.constant 0 : index
    %c0_4 = arith.constant 0 : index
    %3 = vector.load %arg3[%c0_3, %c0_4] : memref<32x128xf32, #tpu.memory_space<vmem>>, vector<32x128xf32>
    %4 = arith.addf %2, %3 : vector<32x128xf32>
    %c0_5 = arith.constant 0 : index
    %c0_6 = arith.constant 0 : index
    %5 = vector.load %arg4[%c0_5, %c0_6] : memref<32x128xf32, #tpu.memory_space<vmem>>, vector<32x128xf32>
    tpu.vector_store %arg4[%c0_5, %c0_6], %4 {strides = array<i32>} : memref<32x128xf32, #tpu.memory_space<vmem>>, vector<32x128xf32>,
    return
  }
  func.func @transform_0(%arg0: i32) -> (i32, i32) {
    %c0_i32 = arith.constant 0 : i32
    %c0_i32_0 = arith.constant 0 : i32
    return %arg0, %c0_i32 : i32, i32
  }
  func.func @transform_1(%arg0: i32) -> (i32, i32) {
    %c0_i32 = arith.constant 0 : i32
    %c0_i32_0 = arith.constant 0 : i32
    %c0_i32_1 = arith.constant 0 : i32
    return %c0_i32, %c0_i32_0 : i32, i32
  }
  func.func @transform_2(%arg0: i32) -> (i32, i32) {
    %c1_i32 = arith.constant 1 : i32
    %c0_i32 = arith.constant 0 : i32
    %0 = arith.cmpi eq, %c1_i32, %c0_i32 : i32
    %c1_i32_0 = arith.constant 1 : i32
    %1 = arith.select %0, %c1_i32_0, %c1_i32 : i32
    %2 = arith.remsi %arg0, %1 : i32
    %c0_i32_1 = arith.constant 0 : i32
    %3 = arith.cmpi ne, %2, %c0_i32_1 : i32
    %c0_i32_2 = arith.constant 0 : i32
    %4 = arith.cmpi slt, %2, %c0_i32_2 : i32
    %c0_i32_3 = arith.constant 0 : i32
    %5 = arith.cmpi slt, %1, %c0_i32_3 : i32
    %6 = arith.xori %4, %5 : i1
    %7 = arith.andi %6, %3 : i1
    %8 = arith.addi %2, %1 : i32
    %9 = arith.select %7, %8, %2 : i32
    %c0_i32_4 = arith.constant 0 : i32
    %c0_i32_5 = arith.constant 0 : i32
    return %9, %c0_i32_4 : i32, i32
  }
  func.func @transform_3(%arg0: i32) -> (i32, i32) {
    %c0_i32 = arith.constant 0 : i32
    %c0_i32_0 = arith.constant 0 : i32
    return %arg0, %c0_i32 : i32, i32
  }
}

</mosaic_0001>

<bundles_post_ra>
// kernel: patch_embedding.1
= control target key start
LH: loop header
LB: loop body
LE: loop exit
PB: predicated region body
PF: predicated region fallthrough
CT: control target
= control target key end

     0   :  { %s465_s12 = smov 0   ;;  %s522_s0 = inlined_call_operand.vmem [shape: bf16[64,128], index: 0, kind: input, shape index: {}]   ;;  %s523_s1 = inlined_call_operand.vmem [shape: bf16[128,128], index: 1, kind: input, shape index: {}]   ;;  %s524_s2 = inlined_call_operand.vmem [shape: f32[32,128], index: 2, kind: input, shape index: {}]   ;;  %s525_s3 = inlined_call_operand.vmem [shape: f32[64,128], index: 3, kind: output, shape index: {}]  }
   0x1 LB: > { %s368_s13 = sadd.s32 4294967295, %s443_s12   ;;  %p372_p0 = scmp.ge.s32.totalorder %s443_s12, 1  ;;  %s443_s12 = sphi %s465_s12, %s13_s12  }
   0x2   : > { %p138_p1 = scmp.lt.s32.totalorder %s443_s12, 3 }
   0x4   : > { %p139_p2 = pnand %p372_p0, %p138_p1 }
   0x5   : > { %s373_s16 = sshll.u32 (!%p139_p2), %s368_s13, 2 }
   0x6   : > { %142 = sbr.rel (%p139_p2) target bundleno = 246 (0xf6), region = 32  ;;  %p163_p3 = scmp.lt.s32.totalorder (!%p139_p2), %s373_s16, 7 }
   0xb   : > { %v427_v0 = vld [vmem:[%s523_s1 + $0x38] sm:$0xff]   ;;  %v428_v1 = vld [vmem:[%s523_s1 + $0x30] sm:$0xff]   ;;  %s527_s16 = smov (!%p163_p3, %s373_s16), 7  ;;  %v429_v2 = vld [vmem:[%s523_s1 + $0x28] sm:$0xff]  }
   0xc   : > { %399 = vmatprep.subr.bf16.mxu0 %v427_v0  ;;  %s374_s21 = sshll.u32 %s527_s16, 2  ;;  %v430_v3 = vld [vmem:[%s523_s1 + $0x20] sm:$0xff]   ;;  %v431_v5 = vld [vmem:[%s523_s1 + $0x18] sm:$0xff]   ;;  %v432_v6 = vld [vmem:[%s523_s1 + $0x10] sm:$0xff]   ;;  %s376_s8 = sshll.u32 %s527_s16, 3 }
   0xd   : > { %400 = vmatpush3.bf16.msra.mxu0 %v427_v0  ;;  %s166_s24 = scalar_lea.vmem %s522_s0, %s374_s21  ;;  %v433_v7 = vld [vmem:[%s523_s1 + $0x8] sm:$0xff]   ;;  %v434_v8 = vld [vmem:[%s523_s1] sm:$0xff]   ;;  %s172_s14 = scalar_lea.vmem %s525_s3, %s376_s8  ;;  %v197_v16 = vld [vmem:[%s524_s2 + $0x10] sm:$0xff] }
   0xe   : > { %401 = vmatprep.subr.bf16.mxu0 %v428_v1  ;;  %v435_v4 = vld [vmem:[%s166_s24] sm:$0xff]   ;;  %v436_v9 = vld [vmem:[%s166_s24 + $0x8] sm:$0xff]   ;;  %v198_v17 = vld [vmem:[%s524_s2 + $0x18] sm:$0xff] }
   0xf   : > { %415 = vmatprep.mubr.bf16.mxu0 %v435_v4  ;;  %v195_v11 = vld [vmem:[%s524_s2] sm:$0xff]  ;;  %v196_v15 = vld [vmem:[%s524_s2 + $0x8] sm:$0xff] }
  0x11   : > { %402 = vmatpush3.bf16.msra.mxu0 %v428_v1 }
  0x12   : > { %403 = vmatprep.subr.bf16.mxu0 %v429_v2 }
  0x15   : > { %404 = vmatpush3.bf16.msra.mxu0 %v429_v2 }
  0x16   : > { %405 = vmatprep.subr.bf16.mxu0 %v430_v3 }
  0x19   : > { %406 = vmatpush3.bf16.msra.mxu0 %v430_v3 }
  0x1a   : > { %407 = vmatprep.subr.bf16.mxu0 %v431_v5 }
  0x1d   : > { %408 = vmatpush3.bf16.msra.mxu0 %v431_v5 }
  0x1e   : > { %409 = vmatprep.subr.bf16.mxu0 %v432_v6 }
  0x21   : > { %410 = vmatpush3.bf16.msra.mxu0 %v432_v6 }
  0x22   : > { %411 = vmatprep.subr.bf16.mxu0 %v433_v7 }
  0x25   : > { %412 = vmatpush3.bf16.msra.mxu0 %v433_v7 }
  0x26   : > { %413 = vmatprep.subr.bf16.mxu0 %v434_v8 }
  0x29   : > { %414 = vmatpush3.bf16.msra.mxu0 %v434_v8 }
  0x2c   : > { %416 = vmatmul.mubr.bf16.vlgmr.msra.gmra.mxu0 %v436_v9 }
  0xec   : > { %v417_v10 = vpop.f32.mrf.mxu0 }
  0xed   : > { %v302_v20 = vadd.f32 %v417_v10, %v197_v16 }
  0xee   : > { %v293_v12 = vpop.f32.mrf.mxu0 }
  0xef   : > { %v294_v13 = vadd.f32 %v293_v12, %v195_v11  ;;  %310 = vst [vmem:[%s172_s14 + $0x10] sm:$0xff] %v302_v20 }
  0xf0   : > { %v418_v14 = vpop.f32.mrf.mxu0 }
  0xf1   : > { %308 = vst [vmem:[%s172_s14] sm:$0xff] %v294_v13  ;;  %v305_v21 = vadd.f32 %v418_v14, %v198_v17 }
  0xf2   : > { %v296_v18 = vpop.f32.mrf.mxu0 }
  0xf3   : > { %v297_v19 = vadd.f32 %v296_v18, %v196_v15  ;;  %311 = vst [vmem:[%s172_s14 + $0x18] sm:$0xff] %v305_v21 }
  0xf5   : > { %309 = vst [vmem:[%s172_s14 + $0x8] sm:$0xff] %v297_v19 }
  0xf6 PF: > { %s13_s12 = sadd.s32 1, %s443_s12  }
  0xf7   : > { %p10_p4 = scmp.ge.s32.totalorder %s13_s12, 4  }
  0xf9   :  { %12 = sbr.rel (!%p10_p4) target bundleno = 1 (0x1), region = 62 }

</bundles_post_ra>
